<compile_context>
chip_gen: v6e
topology: v6e:2x2x1
jax: 0.10.0
libtpu: 0.0.40
codegen_flags: <defaults>
</compile_context>

<pallas_src>
import functools

import jax
import jax.numpy as jnp
from jax.experimental import pallas as pl
from jax.experimental.pallas import tpu as pltpu

EPS = 1e-5


def _layer_norm_f32(y, gamma, beta):
    mu = jnp.mean(y, axis=-1, keepdims=True)
    var = jnp.mean(jnp.square(y - mu), axis=-1, keepdims=True)  # biased (matches nn.LayerNorm)
    return (y - mu) * jax.lax.rsqrt(var + EPS) * gamma + beta


def _full_spec(shape):
    # single grid step, block = full array (no (8,128) padding required)
    return pl.BlockSpec(shape, lambda i: tuple(0 for _ in shape))


# --------------------------------------------------------------------------
# Kernel 1: all per-edge-type hyperedge message matmuls of one GNN layer
#   msg_t = relu(feats_t @ W_t + b_t)      (one launch for every edge type)
# --------------------------------------------------------------------------
def _edge_msgs_kernel(*refs, n_types):
    ins = refs[: 3 * n_types]
    outs = refs[3 * n_types :]
    for t in range(n_types):
        f = ins[3 * t][...]          # f32 gathered features
        w = ins[3 * t + 1][...]      # bf16 weight
        b = ins[3 * t + 2][...]      # f32 bias (1, D)
        y = jnp.dot(f.astype(jnp.bfloat16), w, preferred_element_type=jnp.float32) + b
        outs[t][...] = jnp.maximum(y, 0.0)


def edge_messages(feats_list, w_list, b_list):
    n = len(feats_list)
    args, in_specs, out_shapes, out_specs = [], [], [], []
    for f, w, b in zip(feats_list, w_list, b_list):
        args += [f, w, b]
        in_specs += [_full_spec(f.shape), _full_spec(w.shape), _full_spec(b.shape)]
        o_shape = (f.shape[0], w.shape[1])
        out_shapes.append(jax.ShapeDtypeStruct(o_shape, jnp.float32))
        out_specs.append(_full_spec(o_shape))
    kern = functools.partial(_edge_msgs_kernel, n_types=n)
    return pl.pallas_call(
        kern,
        grid=(1,),
        out_shape=tuple(out_shapes),
        in_specs=in_specs,
        out_specs=tuple(out_specs),
    )(*args)


# --------------------------------------------------------------------------
# Kernel 2: fused self-transform + combine + inter-layer LayerNorm
#   y = LN(relu(x @ W_self + b_self + agg))
# --------------------------------------------------------------------------
def _self_combine_ln_kernel(x_ref, agg_ref, w_ref, b_ref, g_ref, bt_ref, o_ref):
    y = jnp.dot(x_ref[...].astype(jnp.bfloat16), w_ref[...],
                preferred_element_type=jnp.float32)
    y = jnp.maximum(y + b_ref[...] + agg_ref[...], 0.0)
    o_ref[...] = _layer_norm_f32(y, g_ref[...], bt_ref[...]).astype(o_ref.dtype)


def self_combine_ln(x, agg, w, b, gamma, beta):
    M, D = x.shape
    return pl.pallas_call(
        _self_combine_ln_kernel,
        grid=(1,),
        out_shape=jax.ShapeDtypeStruct((M, D), jnp.float32),
        in_specs=[_full_spec(x.shape), _full_spec(agg.shape), _full_spec(w.shape),
                  _full_spec(b.shape), _full_spec(gamma.shape), _full_spec(beta.shape)],
        out_specs=_full_spec((M, D)),
    )(x, agg, w, b, gamma, beta)


# --------------------------------------------------------------------------
# Kernel 3: whole regression MLP + output head in one launch
#   for each layer: y = relu(LN(y @ W + b))
#   head (output_size == 1): out = sum(y * w_out, -1) + b_out   (VPU/XLU, no MXU)
# --------------------------------------------------------------------------
def _mlp_head_kernel(*refs, n_layers):
    x_ref = refs[0]
    out_ref = refs[-1]
    p = refs[1:-1]
    y = x_ref[...]
    for l in range(n_layers):
        w, b, g, bt = p[4 * l : 4 * l + 4]
        y = jnp.dot(y.astype(jnp.bfloat16), w[...],
                    preferred_element_type=jnp.float32) + b[...]
        y = jnp.maximum(_layer_norm_f32(y, g[...], bt[...]), 0.0)
    ow = p[4 * n_layers][...]       # (1, D)
    ob = p[4 * n_layers + 1][...]   # (1, 1)
    out_ref[...] = jnp.sum(y * ow, axis=-1, keepdims=True) + ob


def mlp_head(x, mlp_layers, out_w, out_b):
    M, D = x.shape
    n_layers = len(mlp_layers)
    args, in_specs = [x], [_full_spec(x.shape)]
    for lp in mlp_layers:
        for k in ("w", "b", "ln_gamma", "ln_beta"):
            args.append(lp[k])
            in_specs.append(_full_spec(lp[k].shape))
    args += [out_w, out_b]
    in_specs += [_full_spec(out_w.shape), _full_spec(out_b.shape)]
    kern = functools.partial(_mlp_head_kernel, n_layers=n_layers)
    return pl.pallas_call(
        kern,
        grid=(1,),
        out_shape=jax.ShapeDtypeStruct((M, 1), jnp.float32),
        in_specs=in_specs,
        out_specs=_full_spec((M, 1)),
    )(*args)


# --------------------------------------------------------------------------
# HyperConv layer (assumed semantics, see TODO above)
# --------------------------------------------------------------------------
def hyper_conv_layer(x, edge_lists, lp):
    N, D = x.shape
    etypes = sorted(edge_lists.keys())

    # gather member node features and concatenate along the feature axis (glue)
    feats_list = []
    for et in etypes:
        nodes = edge_lists[et]
        E_t, arity = nodes.shape
        feats_list.append(x[nodes.reshape(-1)].reshape(E_t, arity * D))

    # one Pallas launch for every edge type's message matmul + relu
    msgs = edge_messages(
        feats_list,
        [lp["edge_w"][et] for et in etypes],
        [lp["edge_b"][et] for et in etypes],
    )

    # scatter each hyperedge message to every member node (glue)
    agg = jnp.zeros((N, D), jnp.float32)
    for et, msg in zip(etypes, msgs):
        nodes = edge_lists[et]
        E_t, arity = nodes.shape
        agg = agg.at[nodes.reshape(-1)].add(jnp.repeat(msg, arity, axis=0))

    # fused self transform + combine + inter-layer LayerNorm (one launch)
    return self_combine_ln(x, agg, lp["self_w"], lp["self_b"],
                           lp["ln_gamma"], lp["ln_beta"])


# --------------------------------------------------------------------------
# Full forward pass (default hyperparameters, eval mode)
# --------------------------------------------------------------------------
def hyper_classification_forward(params, node_ids, target_indices, edge_lists):
    # feature_size == 1  ->  ravel + Embedding lookup (gather, glue)
    x = params["embedding"][node_ids.reshape(-1)]

    # GNN layers: HyperConv -> LayerNorm (dense/residual/dropout inactive under
    # defaults + eval mode)
    for lp in params["gnn_layers"]:
        x = hyper_conv_layer(x, edge_lists, lp)

    # use_intermediate_gnn_results == False -> plain index_select on targets
    x = x[target_indices.reshape(-1)]

    # regression MLP (Linear -> LayerNorm -> relu) x L  + output head, fused
    return mlp_head(x, params["mlp_layers"], params["out_w"], params["out_b"])


forward_jit = jax.jit(hyper_classification_forward)


# --------------------------------------------------------------------------
# Deterministic parameter construction (weights pre-cast to bf16 once,
# biases / LayerNorm params pre-shaped (1, D) in f32)
# --------------------------------------------------------------------------
def make_params(key, vocab_size, emb, num_gnn_layers, num_linear_layer,
                edge_arity_dict, output_size):
    def nxt():
        nonlocal key
        key, sub = jax.random.split(key)
        return sub

    params = {}
    params["embedding"] = 0.1 * jax.random.normal(nxt(), (vocab_size, emb), jnp.float32)

    gnn_layers = []
    for _ in range(num_gnn_layers):
        lp = {
            "edge_w": {}, "edge_b": {},
            "self_w": (0.1 * jax.random.normal(nxt(), (emb, emb), jnp.float32)
                       ).astype(jnp.bfloat16),
            "self_b": jnp.zeros((1, emb), jnp.float32),
            "ln_gamma": jnp.ones((1, emb), jnp.float32),
            "ln_beta": jnp.zeros((1, emb), jnp.float32),
        }
        for etype, arity in edge_arity_dict.items():
            lp["edge_w"][etype] = (0.1 * jax.random.normal(
                nxt(), (arity * emb, emb), jnp.float32)).astype(jnp.bfloat16)
            lp["edge_b"][etype] = jnp.zeros((1, emb), jnp.float32)
        gnn_layers.append(lp)
    params["gnn_layers"] = gnn_layers

    mlp_layers = []
    for _ in range(num_linear_layer):
        mlp_layers.append({
            "w": (0.1 * jax.random.normal(nxt(), (emb, emb), jnp.float32)
                  ).astype(jnp.bfloat16),
            "b": jnp.zeros((1, emb), jnp.float32),
            "ln_gamma": jnp.ones((1, emb), jnp.float32),
            "ln_beta": jnp.zeros((1, emb), jnp.float32),
        })
    params["mlp_layers"] = mlp_layers

    assert output_size == 1  # label_size == 2  ->  head implemented as a lane reduction
    params["out_w"] = 0.1 * jax.random.normal(nxt(), (1, emb), jnp.float32)
    params["out_b"] = jnp.zeros((1, 1), jnp.float32)
    return params


if __name__ == "__main__":
    key = jax.random.PRNGKey(0)

    # model config (defaults of Hyper_classification)
    EMB = 64
    NUM_GNN_LAYERS = 2
    NUM_LINEAR_LAYER = 2
    VOCAB = 30
    LABEL_SIZE = 2            # -> output_size = 1
    edge_arity_dict = {"binary": 2, "ternary": 3}

    # small synthetic hypergraph
    N_NODES = 16
    k1, k2, k3, k4, kparam = jax.random.split(key, 5)
    node_ids = jax.random.randint(k1, (N_NODES,), 0, VOCAB, dtype=jnp.int32)
    edge_lists = {
        "binary": jax.random.randint(k2, (6, 2), 0, N_NODES, dtype=jnp.int32),
        "ternary": jax.random.randint(k3, (4, 3), 0, N_NODES, dtype=jnp.int32),
    }
    target_indices = jax.random.randint(k4, (3,), 0, N_NODES, dtype=jnp.int32)

    params = make_params(kparam, VOCAB, EMB, NUM_GNN_LAYERS, NUM_LINEAR_LAYER,
                         edge_arity_dict, output_size=1)

    out = forward_jit(params, node_ids, target_indices, edge_lists)
    out = jax.block_until_ready(out)
    assert out.shape == (3, 1), out.shape
    assert bool(jnp.all(jnp.isfinite(out)))
    print("KERNEL_OK")
</pallas_src>

<mosaic_0001>
module attributes {stable_mosaic.version = 11 : i64} {
  func.func @_edge_msgs_kernel(%arg0: i32, %arg1: memref<6x128xf32, #tpu.memory_space<vmem>>, %arg2: memref<128x64xbf16, #tpu.memory_space<vmem>>, %arg3: memref<1x64xf32, #tpu.memory_space<vmem>>, %arg4: memref<4x192xf32, #tpu.memory_space<vmem>>, %arg5: memref<192x64xbf16, #tpu.memory_space<vmem>>, %arg6: memref<1x64xf32, #tpu.memory_space<vmem>>, %arg7: memref<6x64xf32, #tpu.memory_space<vmem>>, %arg8: memref<4x64xf32, #tpu.memory_space<vmem>>) attributes {dimension_semantics = [#tpu.dimension_semantics<arbitrary>], iteration_bounds = array<i64: 1>, scalar_prefetch = 0 : i64, scratch_operands = 0 : i64, tpu.core_type = #tpu.core_type<tc>, window_params = [{pipeline_mode = #tpu.pipeline_mode<synchronous>, transform_indices = @transform_0, window_bounds = array<i64: 6, 128>}, {pipeline_mode = #tpu.pipeline_mode<synchronous>, transform_indices = @transform_1, window_bounds = array<i64: 128, 64>}, {pipeline_mode = #tpu.pipeline_mode<synchronous>, transform_indices = @transform_2, window_bounds = array<i64: 1, 64>}, {pipeline_mode = #tpu.pipeline_mode<synchronous>, transform_indices = @transform_3, window_bounds = array<i64: 4, 192>}, {pipeline_mode = #tpu.pipeline_mode<synchronous>, transform_indices = @transform_4, window_bounds = array<i64: 192, 64>}, {pipeline_mode = #tpu.pipeline_mode<synchronous>, transform_indices = @transform_5, window_bounds = array<i64: 1, 64>}, {pipeline_mode = #tpu.pipeline_mode<synchronous>, transform_indices = @transform_6, window_bounds = array<i64: 6, 64>}, {pipeline_mode = #tpu.pipeline_mode<synchronous>, transform_indices = @transform_7, window_bounds = array<i64: 4, 64>}]} {
    %c0 = arith.constant 0 : index
    %c0_0 = arith.constant 0 : index
    %0 = vector.load %arg1[%c0, %c0_0] : memref<6x128xf32, #tpu.memory_space<vmem>>, vector<6x128xf32>
    %c0_1 = arith.constant 0 : index
    %c0_2 = arith.constant 0 : index
    %1 = vector.load %arg2[%c0_1, %c0_2] : memref<128x64xbf16, #tpu.memory_space<vmem>>, vector<128x64xbf16>
    %c0_3 = arith.constant 0 : index
    %c0_4 = arith.constant 0 : index
    %2 = vector.load %arg3[%c0_3, %c0_4] : memref<1x64xf32, #tpu.memory_space<vmem>>, vector<1x64xf32>
    %3 = arith.truncf %0 : vector<6x128xf32> to vector<6x128xbf16>
    %cst = arith.constant dense<0.000000e+00> : vector<6x64xf32>
    %4 = tpu.matmul %3, %1, %cst {dimension_numbers = #tpu.dot_dimension_numbers<[1], [0], [0], [1], [0, 0, 1, 1], [], []>} : vector<6x128xbf16>, vector<128x64xbf16>, vector<6x64xf32> -> vector<6x64xf32>
    %5 = vector.broadcast %2 : vector<1x64xf32> to vector<6x64xf32>
    %6 = arith.addf %4, %5 : vector<6x64xf32>
    %cst_5 = arith.constant 0.000000e+00 : f32
    %7 = vector.broadcast %cst_5 : f32 to vector<6x64xf32>
    %8 = arith.maximumf %6, %7 : vector<6x64xf32>
    %c0_6 = arith.constant 0 : index
    %c0_7 = arith.constant 0 : index
    %9 = vector.load %arg7[%c0_6, %c0_7] : memref<6x64xf32, #tpu.memory_space<vmem>>, vector<6x64xf32>
    tpu.vector_store %arg7[%c0_6, %c0_7], %8 {strides = array<i32>} : memref<6x64xf32, #tpu.memory_space<vmem>>, vector<6x64xf32>,
    %c0_8 = arith.constant 0 : index
    %c0_9 = arith.constant 0 : index
    %10 = vector.load %arg4[%c0_8, %c0_9] : memref<4x192xf32, #tpu.memory_space<vmem>>, vector<4x192xf32>
    %c0_10 = arith.constant 0 : index
    %c0_11 = arith.constant 0 : index
    %11 = vector.load %arg5[%c0_10, %c0_11] : memref<192x64xbf16, #tpu.memory_space<vmem>>, vector<192x64xbf16>
    %c0_12 = arith.constant 0 : index
    %c0_13 = arith.constant 0 : index
    %12 = vector.load %arg6[%c0_12, %c0_13] : memref<1x64xf32, #tpu.memory_space<vmem>>, vector<1x64xf32>
    %13 = arith.truncf %10 : vector<4x192xf32> to vector<4x192xbf16>
    %cst_14 = arith.constant dense<0.000000e+00> : vector<4x64xf32>
    %14 = tpu.matmul %13, %11, %cst_14 {dimension_numbers = #tpu.dot_dimension_numbers<[1], [0], [0], [1], [0, 0, 1, 1], [], []>} : vector<4x192xbf16>, vector<192x64xbf16>, vector<4x64xf32> -> vector<4x64xf32>
    %15 = vector.broadcast %12 : vector<1x64xf32> to vector<4x64xf32>
    %16 = arith.addf %14, %15 : vector<4x64xf32>
    %cst_15 = arith.constant 0.000000e+00 : f32
    %17 = vector.broadcast %cst_15 : f32 to vector<4x64xf32>
    %18 = arith.maximumf %16, %17 : vector<4x64xf32>
    %c0_16 = arith.constant 0 : index
    %c0_17 = arith.constant 0 : index
    %19 = vector.load %arg8[%c0_16, %c0_17] : memref<4x64xf32, #tpu.memory_space<vmem>>, vector<4x64xf32>
    tpu.vector_store %arg8[%c0_16, %c0_17], %18 {strides = array<i32>} : memref<4x64xf32, #tpu.memory_space<vmem>>, vector<4x64xf32>,
    return
  }
  func.func @transform_0(%arg0: i32) -> (i32, i32) {
    %c0_i32 = arith.constant 0 : i32
    %c0_i32_0 = arith.constant 0 : i32
    %c0_i32_1 = arith.constant 0 : i32
    return %c0_i32, %c0_i32_0 : i32, i32
  }
  func.func @transform_1(%arg0: i32) -> (i32, i32) {
    %c0_i32 = arith.constant 0 : i32
    %c0_i32_0 = arith.constant 0 : i32
    %c0_i32_1 = arith.constant 0 : i32
    return %c0_i32, %c0_i32_0 : i32, i32
  }
  func.func @transform_2(%arg0: i32) -> (i32, i32) {
    %c0_i32 = arith.constant 0 : i32
    %c0_i32_0 = arith.constant 0 : i32
    %c0_i32_1 = arith.constant 0 : i32
    return %c0_i32, %c0_i32_0 : i32, i32
  }
  func.func @transform_3(%arg0: i32) -> (i32, i32) {
    %c0_i32 = arith.constant 0 : i32
    %c0_i32_0 = arith.constant 0 : i32
    %c0_i32_1 = arith.constant 0 : i32
    return %c0_i32, %c0_i32_0 : i32, i32
  }
  func.func @transform_4(%arg0: i32) -> (i32, i32) {
    %c0_i32 = arith.constant 0 : i32
    %c0_i32_0 = arith.constant 0 : i32
    %c0_i32_1 = arith.constant 0 : i32
    return %c0_i32, %c0_i32_0 : i32, i32
  }
  func.func @transform_5(%arg0: i32) -> (i32, i32) {
    %c0_i32 = arith.constant 0 : i32
    %c0_i32_0 = arith.constant 0 : i32
    %c0_i32_1 = arith.constant 0 : i32
    return %c0_i32, %c0_i32_0 : i32, i32
  }
  func.func @transform_6(%arg0: i32) -> (i32, i32) {
    %c0_i32 = arith.constant 0 : i32
    %c0_i32_0 = arith.constant 0 : i32
    %c0_i32_1 = arith.constant 0 : i32
    return %c0_i32, %c0_i32_0 : i32, i32
  }
  func.func @transform_7(%arg0: i32) -> (i32, i32) {
    %c0_i32 = arith.constant 0 : i32
    %c0_i32_0 = arith.constant 0 : i32
    %c0_i32_1 = arith.constant 0 : i32
    return %c0_i32, %c0_i32_0 : i32, i32
  }
}

module attributes {stable_mosaic.version = 11 : i64} {
  func.func @_self_combine_ln_kernel(%arg0: i32, %arg1: memref<16x64xf32, #tpu.memory_space<vmem>>, %arg2: memref<16x64xf32, #tpu.memory_space<vmem>>, %arg3: memref<64x64xbf16, #tpu.memory_space<vmem>>, %arg4: memref<1x64xf32, #tpu.memory_space<vmem>>, %arg5: memref<1x64xf32, #tpu.memory_space<vmem>>, %arg6: memref<1x64xf32, #tpu.memory_space<vmem>>, %arg7: memref<16x64xf32, #tpu.memory_space<vmem>>) attributes {dimension_semantics = [#tpu.dimension_semantics<arbitrary>], iteration_bounds = array<i64: 1>, scalar_prefetch = 0 : i64, scratch_operands = 0 : i64, tpu.core_type = #tpu.core_type<tc>, window_params = [{pipeline_mode = #tpu.pipeline_mode<synchronous>, transform_indices = @transform_0, window_bounds = array<i64: 16, 64>}, {pipeline_mode = #tpu.pipeline_mode<synchronous>, transform_indices = @transform_1, window_bounds = array<i64: 16, 64>}, {pipeline_mode = #tpu.pipeline_mode<synchronous>, transform_indices = @transform_2, window_bounds = array<i64: 64, 64>}, {pipeline_mode = #tpu.pipeline_mode<synchronous>, transform_indices = @transform_3, window_bounds = array<i64: 1, 64>}, {pipeline_mode = #tpu.pipeline_mode<synchronous>, transform_indices = @transform_4, window_bounds = array<i64: 1, 64>}, {pipeline_mode = #tpu.pipeline_mode<synchronous>, transform_indices = @transform_5, window_bounds = array<i64: 1, 64>}, {pipeline_mode = #tpu.pipeline_mode<synchronous>, transform_indices = @transform_6, window_bounds = array<i64: 16, 64>}]} {
    %c0 = arith.constant 0 : index
    %c0_0 = arith.constant 0 : index
    %0 = vector.load %arg1[%c0, %c0_0] : memref<16x64xf32, #tpu.memory_space<vmem>>, vector<16x64xf32>
    %1 = arith.truncf %0 : vector<16x64xf32> to vector<16x64xbf16>
    %c0_1 = arith.constant 0 : index
    %c0_2 = arith.constant 0 : index
    %2 = vector.load %arg3[%c0_1, %c0_2] : memref<64x64xbf16, #tpu.memory_space<vmem>>, vector<64x64xbf16>
    %cst = arith.constant dense<0.000000e+00> : vector<16x64xf32>
    %3 = tpu.matmul %1, %2, %cst {dimension_numbers = #tpu.dot_dimension_numbers<[1], [0], [0], [1], [0, 0, 1, 1], [], []>} : vector<16x64xbf16>, vector<64x64xbf16>, vector<16x64xf32> -> vector<16x64xf32>
    %c0_3 = arith.constant 0 : index
    %c0_4 = arith.constant 0 : index
    %4 = vector.load %arg4[%c0_3, %c0_4] : memref<1x64xf32, #tpu.memory_space<vmem>>, vector<1x64xf32>
    %5 = vector.broadcast %4 : vector<1x64xf32> to vector<16x64xf32>
    %6 = arith.addf %3, %5 : vector<16x64xf32>
    %c0_5 = arith.constant 0 : index
    %c0_6 = arith.constant 0 : index
    %7 = vector.load %arg2[%c0_5, %c0_6] : memref<16x64xf32, #tpu.memory_space<vmem>>, vector<16x64xf32>
    %8 = arith.addf %6, %7 : vector<16x64xf32>
    %cst_7 = arith.constant 0.000000e+00 : f32
    %9 = vector.broadcast %cst_7 : f32 to vector<16x64xf32>
    %10 = arith.maximumf %8, %9 : vector<16x64xf32>
    %c0_8 = arith.constant 0 : index
    %c0_9 = arith.constant 0 : index
    %11 = vector.load %arg5[%c0_8, %c0_9] : memref<1x64xf32, #tpu.memory_space<vmem>>, vector<1x64xf32>
    %c0_10 = arith.constant 0 : index
    %c0_11 = arith.constant 0 : index
    %12 = vector.load %arg6[%c0_10, %c0_11] : memref<1x64xf32, #tpu.memory_space<vmem>>, vector<1x64xf32>
    %cst_12 = arith.constant dense<0.000000e+00> : vector<16xf32>
    %13 = vector.multi_reduction <add>, %10, %cst_12 [1] : vector<16x64xf32> to vector<16xf32>
    %14 = vector.shape_cast %13 : vector<16xf32> to vector<16x1xf32>
    %cst_13 = arith.constant 6.400000e+01 : f32
    %15 = vector.broadcast %cst_13 : f32 to vector<16x1xf32>
    %16 = arith.divf %14, %15 : vector<16x1xf32>
    %17 = vector.broadcast %16 : vector<16x1xf32> to vector<16x64xf32>
    %18 = arith.subf %10, %17 : vector<16x64xf32>
    %19 = arith.mulf %18, %18 : vector<16x64xf32>
    %cst_14 = arith.constant dense<0.000000e+00> : vector<16xf32>
    %20 = vector.multi_reduction <add>, %19, %cst_14 [1] : vector<16x64xf32> to vector<16xf32>
    %21 = vector.shape_cast %20 : vector<16xf32> to vector<16x1xf32>
    %cst_15 = arith.constant 6.400000e+01 : f32
    %22 = vector.broadcast %cst_15 : f32 to vector<16x1xf32>
    %23 = arith.divf %21, %22 : vector<16x1xf32>
    %24 = vector.broadcast %16 : vector<16x1xf32> to vector<16x64xf32>
    %25 = arith.subf %10, %24 : vector<16x64xf32>
    %cst_16 = arith.constant 9.99999974E-6 : f32
    %26 = vector.broadcast %cst_16 : f32 to vector<16x1xf32>
    %27 = arith.addf %23, %26 : vector<16x1xf32>
    %28 = math.rsqrt %27 : vector<16x1xf32>
    %29 = vector.broadcast %28 : vector<16x1xf32> to vector<16x64xf32>
    %30 = arith.mulf %25, %29 : vector<16x64xf32>
    %31 = vector.broadcast %11 : vector<1x64xf32> to vector<16x64xf32>
    %32 = arith.mulf %30, %31 : vector<16x64xf32>
    %33 = vector.broadcast %12 : vector<1x64xf32> to vector<16x64xf32>
    %34 = arith.addf %32, %33 : vector<16x64xf32>
    %c0_17 = arith.constant 0 : index
    %c0_18 = arith.constant 0 : index
    %35 = vector.load %arg7[%c0_17, %c0_18] : memref<16x64xf32, #tpu.memory_space<vmem>>, vector<16x64xf32>
    tpu.vector_store %arg7[%c0_17, %c0_18], %34 {strides = array<i32>} : memref<16x64xf32, #tpu.memory_space<vmem>>, vector<16x64xf32>,
    return
  }
  func.func @transform_0(%arg0: i32) -> (i32, i32) {
    %c0_i32 = arith.constant 0 : i32
    %c0_i32_0 = arith.constant 0 : i32
    %c0_i32_1 = arith.constant 0 : i32
    return %c0_i32, %c0_i32_0 : i32, i32
  }
  func.func @transform_1(%arg0: i32) -> (i32, i32) {
    %c0_i32 = arith.constant 0 : i32
    %c0_i32_0 = arith.constant 0 : i32
    %c0_i32_1 = arith.constant 0 : i32
    return %c0_i32, %c0_i32_0 : i32, i32
  }
  func.func @transform_2(%arg0: i32) -> (i32, i32) {
    %c0_i32 = arith.constant 0 : i32
    %c0_i32_0 = arith.constant 0 : i32
    %c0_i32_1 = arith.constant 0 : i32
    return %c0_i32, %c0_i32_0 : i32, i32
  }
  func.func @transform_3(%arg0: i32) -> (i32, i32) {
    %c0_i32 = arith.constant 0 : i32
    %c0_i32_0 = arith.constant 0 : i32
    %c0_i32_1 = arith.constant 0 : i32
    return %c0_i32, %c0_i32_0 : i32, i32
  }
  func.func @transform_4(%arg0: i32) -> (i32, i32) {
    %c0_i32 = arith.constant 0 : i32
    %c0_i32_0 = arith.constant 0 : i32
    %c0_i32_1 = arith.constant 0 : i32
    return %c0_i32, %c0_i32_0 : i32, i32
  }
  func.func @transform_5(%arg0: i32) -> (i32, i32) {
    %c0_i32 = arith.constant 0 : i32
    %c0_i32_0 = arith.constant 0 : i32
    %c0_i32_1 = arith.constant 0 : i32
    return %c0_i32, %c0_i32_0 : i32, i32
  }
  func.func @transform_6(%arg0: i32) -> (i32, i32) {
    %c0_i32 = arith.constant 0 : i32
    %c0_i32_0 = arith.constant 0 : i32
    %c0_i32_1 = arith.constant 0 : i32
    return %c0_i32, %c0_i32_0 : i32, i32
  }
}

module attributes {stable_mosaic.version = 11 : i64} {
  func.func @_mlp_head_kernel(%arg0: i32, %arg1: memref<3x64xf32, #tpu.memory_space<vmem>>, %arg2: memref<64x64xbf16, #tpu.memory_space<vmem>>, %arg3: memref<1x64xf32, #tpu.memory_space<vmem>>, %arg4: memref<1x64xf32, #tpu.memory_space<vmem>>, %arg5: memref<1x64xf32, #tpu.memory_space<vmem>>, %arg6: memref<64x64xbf16, #tpu.memory_space<vmem>>, %arg7: memref<1x64xf32, #tpu.memory_space<vmem>>, %arg8: memref<1x64xf32, #tpu.memory_space<vmem>>, %arg9: memref<1x64xf32, #tpu.memory_space<vmem>>, %arg10: memref<1x64xf32, #tpu.memory_space<vmem>>, %arg11: memref<1x1xf32, #tpu.memory_space<vmem>>, %arg12: memref<3x1xf32, #tpu.memory_space<vmem>>) attributes {dimension_semantics = [#tpu.dimension_semantics<arbitrary>], iteration_bounds = array<i64: 1>, scalar_prefetch = 0 : i64, scratch_operands = 0 : i64, tpu.core_type = #tpu.core_type<tc>, window_params = [{pipeline_mode = #tpu.pipeline_mode<synchronous>, transform_indices = @transform_0, window_bounds = array<i64: 3, 64>}, {pipeline_mode = #tpu.pipeline_mode<synchronous>, transform_indices = @transform_1, window_bounds = array<i64: 64, 64>}, {pipeline_mode = #tpu.pipeline_mode<synchronous>, transform_indices = @transform_2, window_bounds = array<i64: 1, 64>}, {pipeline_mode = #tpu.pipeline_mode<synchronous>, transform_indices = @transform_3, window_bounds = array<i64: 1, 64>}, {pipeline_mode = #tpu.pipeline_mode<synchronous>, transform_indices = @transform_4, window_bounds = array<i64: 1, 64>}, {pipeline_mode = #tpu.pipeline_mode<synchronous>, transform_indices = @transform_5, window_bounds = array<i64: 64, 64>}, {pipeline_mode = #tpu.pipeline_mode<synchronous>, transform_indices = @transform_6, window_bounds = array<i64: 1, 64>}, {pipeline_mode = #tpu.pipeline_mode<synchronous>, transform_indices = @transform_7, window_bounds = array<i64: 1, 64>}, {pipeline_mode = #tpu.pipeline_mode<synchronous>, transform_indices = @transform_8, window_bounds = array<i64: 1, 64>}, {pipeline_mode = #tpu.pipeline_mode<synchronous>, transform_indices = @transform_9, window_bounds = array<i64: 1, 64>}, {pipeline_mode = #tpu.pipeline_mode<synchronous>, transform_indices = @transform_10, window_bounds = array<i64: 1, 1>}, {pipeline_mode = #tpu.pipeline_mode<synchronous>, transform_indices = @transform_11, window_bounds = array<i64: 3, 1>}]} {
    %c0 = arith.constant 0 : index
    %c0_0 = arith.constant 0 : index
    %0 = vector.load %arg1[%c0, %c0_0] : memref<3x64xf32, #tpu.memory_space<vmem>>, vector<3x64xf32>
    %1 = arith.truncf %0 : vector<3x64xf32> to vector<3x64xbf16>
    %c0_1 = arith.constant 0 : index
    %c0_2 = arith.constant 0 : index
    %2 = vector.load %arg2[%c0_1, %c0_2] : memref<64x64xbf16, #tpu.memory_space<vmem>>, vector<64x64xbf16>
    %cst = arith.constant dense<0.000000e+00> : vector<3x64xf32>
    %3 = tpu.matmul %1, %2, %cst {dimension_numbers = #tpu.dot_dimension_numbers<[1], [0], [0], [1], [0, 0, 1, 1], [], []>} : vector<3x64xbf16>, vector<64x64xbf16>, vector<3x64xf32> -> vector<3x64xf32>
    %c0_3 = arith.constant 0 : index
    %c0_4 = arith.constant 0 : index
    %4 = vector.load %arg3[%c0_3, %c0_4] : memref<1x64xf32, #tpu.memory_space<vmem>>, vector<1x64xf32>
    %5 = vector.broadcast %4 : vector<1x64xf32> to vector<3x64xf32>
    %6 = arith.addf %3, %5 : vector<3x64xf32>
    %c0_5 = arith.constant 0 : index
    %c0_6 = arith.constant 0 : index
    %7 = vector.load %arg4[%c0_5, %c0_6] : memref<1x64xf32, #tpu.memory_space<vmem>>, vector<1x64xf32>
    %c0_7 = arith.constant 0 : index
    %c0_8 = arith.constant 0 : index
    %8 = vector.load %arg5[%c0_7, %c0_8] : memref<1x64xf32, #tpu.memory_space<vmem>>, vector<1x64xf32>
    %cst_9 = arith.constant dense<0.000000e+00> : vector<3xf32>
    %9 = vector.multi_reduction <add>, %6, %cst_9 [1] : vector<3x64xf32> to vector<3xf32>
    %10 = vector.shape_cast %9 : vector<3xf32> to vector<3x1xf32>
    %cst_10 = arith.constant 6.400000e+01 : f32
    %11 = vector.broadcast %cst_10 : f32 to vector<3x1xf32>
    %12 = arith.divf %10, %11 : vector<3x1xf32>
    %13 = vector.broadcast %12 : vector<3x1xf32> to vector<3x64xf32>
    %14 = arith.subf %6, %13 : vector<3x64xf32>
    %15 = arith.mulf %14, %14 : vector<3x64xf32>
    %cst_11 = arith.constant dense<0.000000e+00> : vector<3xf32>
    %16 = vector.multi_reduction <add>, %15, %cst_11 [1] : vector<3x64xf32> to vector<3xf32>
    %17 = vector.shape_cast %16 : vector<3xf32> to vector<3x1xf32>
    %cst_12 = arith.constant 6.400000e+01 : f32
    %18 = vector.broadcast %cst_12 : f32 to vector<3x1xf32>
    %19 = arith.divf %17, %18 : vector<3x1xf32>
    %20 = vector.broadcast %12 : vector<3x1xf32> to vector<3x64xf32>
    %21 = arith.subf %6, %20 : vector<3x64xf32>
    %cst_13 = arith.constant 9.99999974E-6 : f32
    %22 = vector.broadcast %cst_13 : f32 to vector<3x1xf32>
    %23 = arith.addf %19, %22 : vector<3x1xf32>
    %24 = math.rsqrt %23 : vector<3x1xf32>
    %25 = vector.broadcast %24 : vector<3x1xf32> to vector<3x64xf32>
    %26 = arith.mulf %21, %25 : vector<3x64xf32>
    %27 = vector.broadcast %7 : vector<1x64xf32> to vector<3x64xf32>
    %28 = arith.mulf %26, %27 : vector<3x64xf32>
    %29 = vector.broadcast %8 : vector<1x64xf32> to vector<3x64xf32>
    %30 = arith.addf %28, %29 : vector<3x64xf32>
    %cst_14 = arith.constant 0.000000e+00 : f32
    %31 = vector.broadcast %cst_14 : f32 to vector<3x64xf32>
    %32 = arith.maximumf %30, %31 : vector<3x64xf32>
    %33 = arith.truncf %32 : vector<3x64xf32> to vector<3x64xbf16>
    %c0_15 = arith.constant 0 : index
    %c0_16 = arith.constant 0 : index
    %34 = vector.load %arg6[%c0_15, %c0_16] : memref<64x64xbf16, #tpu.memory_space<vmem>>, vector<64x64xbf16>
    %cst_17 = arith.constant dense<0.000000e+00> : vector<3x64xf32>
    %35 = tpu.matmul %33, %34, %cst_17 {dimension_numbers = #tpu.dot_dimension_numbers<[1], [0], [0], [1], [0, 0, 1, 1], [], []>} : vector<3x64xbf16>, vector<64x64xbf16>, vector<3x64xf32> -> vector<3x64xf32>
    %c0_18 = arith.constant 0 : index
    %c0_19 = arith.constant 0 : index
    %36 = vector.load %arg7[%c0_18, %c0_19] : memref<1x64xf32, #tpu.memory_space<vmem>>, vector<1x64xf32>
    %37 = vector.broadcast %36 : vector<1x64xf32> to vector<3x64xf32>
    %38 = arith.addf %35, %37 : vector<3x64xf32>
    %c0_20 = arith.constant 0 : index
    %c0_21 = arith.constant 0 : index
    %39 = vector.load %arg8[%c0_20, %c0_21] : memref<1x64xf32, #tpu.memory_space<vmem>>, vector<1x64xf32>
    %c0_22 = arith.constant 0 : index
    %c0_23 = arith.constant 0 : index
    %40 = vector.load %arg9[%c0_22, %c0_23] : memref<1x64xf32, #tpu.memory_space<vmem>>, vector<1x64xf32>
    %cst_24 = arith.constant dense<0.000000e+00> : vector<3xf32>
    %41 = vector.multi_reduction <add>, %38, %cst_24 [1] : vector<3x64xf32> to vector<3xf32>
    %42 = vector.shape_cast %41 : vector<3xf32> to vector<3x1xf32>
    %cst_25 = arith.constant 6.400000e+01 : f32
    %43 = vector.broadcast %cst_25 : f32 to vector<3x1xf32>
    %44 = arith.divf %42, %43 : vector<3x1xf32>
    %45 = vector.broadcast %44 : vector<3x1xf32> to vector<3x64xf32>
    %46 = arith.subf %38, %45 : vector<3x64xf32>
    %47 = arith.mulf %46, %46 : vector<3x64xf32>
    %cst_26 = arith.constant dense<0.000000e+00> : vector<3xf32>
    %48 = vector.multi_reduction <add>, %47, %cst_26 [1] : vector<3x64xf32> to vector<3xf32>
    %49 = vector.shape_cast %48 : vector<3xf32> to vector<3x1xf32>
    %cst_27 = arith.constant 6.400000e+01 : f32
    %50 = vector.broadcast %cst_27 : f32 to vector<3x1xf32>
    %51 = arith.divf %49, %50 : vector<3x1xf32>
    %52 = vector.broadcast %44 : vector<3x1xf32> to vector<3x64xf32>
    %53 = arith.subf %38, %52 : vector<3x64xf32>
    %cst_28 = arith.constant 9.99999974E-6 : f32
    %54 = vector.broadcast %cst_28 : f32 to vector<3x1xf32>
    %55 = arith.addf %51, %54 : vector<3x1xf32>
    %56 = math.rsqrt %55 : vector<3x1xf32>
    %57 = vector.broadcast %56 : vector<3x1xf32> to vector<3x64xf32>
    %58 = arith.mulf %53, %57 : vector<3x64xf32>
    %59 = vector.broadcast %39 : vector<1x64xf32> to vector<3x64xf32>
    %60 = arith.mulf %58, %59 : vector<3x64xf32>
    %61 = vector.broadcast %40 : vector<1x64xf32> to vector<3x64xf32>
    %62 = arith.addf %60, %61 : vector<3x64xf32>
    %cst_29 = arith.constant 0.000000e+00 : f32
    %63 = vector.broadcast %cst_29 : f32 to vector<3x64xf32>
    %64 = arith.maximumf %62, %63 : vector<3x64xf32>
    %c0_30 = arith.constant 0 : index
    %c0_31 = arith.constant 0 : index
    %65 = vector.load %arg10[%c0_30, %c0_31] : memref<1x64xf32, #tpu.memory_space<vmem>>, vector<1x64xf32>
    %c0_32 = arith.constant 0 : index
    %c0_33 = arith.constant 0 : index
    %66 = vector.load %arg11[%c0_32, %c0_33] : memref<1x1xf32, #tpu.memory_space<vmem>>, vector<1x1xf32>
    %67 = vector.broadcast %65 : vector<1x64xf32> to vector<3x64xf32>
    %68 = arith.mulf %64, %67 : vector<3x64xf32>
    %cst_34 = arith.constant dense<0.000000e+00> : vector<3xf32>
    %69 = vector.multi_reduction <add>, %68, %cst_34 [1] : vector<3x64xf32> to vector<3xf32>
    %70 = vector.shape_cast %69 : vector<3xf32> to vector<3x1xf32>
    %71 = vector.broadcast %66 : vector<1x1xf32> to vector<3x1xf32>
    %72 = arith.addf %70, %71 : vector<3x1xf32>
    %c0_35 = arith.constant 0 : index
    %c0_36 = arith.constant 0 : index
    %73 = vector.load %arg12[%c0_35, %c0_36] : memref<3x1xf32, #tpu.memory_space<vmem>>, vector<3x1xf32>
    tpu.vector_store %arg12[%c0_35, %c0_36], %72 {strides = array<i32>} : memref<3x1xf32, #tpu.memory_space<vmem>>, vector<3x1xf32>,
    return
  }
  func.func @transform_0(%arg0: i32) -> (i32, i32) {
    %c0_i32 = arith.constant 0 : i32
    %c0_i32_0 = arith.constant 0 : i32
    %c0_i32_1 = arith.constant 0 : i32
    return %c0_i32, %c0_i32_0 : i32, i32
  }
  func.func @transform_1(%arg0: i32) -> (i32, i32) {
    %c0_i32 = arith.constant 0 : i32
    %c0_i32_0 = arith.constant 0 : i32
    %c0_i32_1 = arith.constant 0 : i32
    return %c0_i32, %c0_i32_0 : i32, i32
  }
  func.func @transform_2(%arg0: i32) -> (i32, i32) {
    %c0_i32 = arith.constant 0 : i32
    %c0_i32_0 = arith.constant 0 : i32
    %c0_i32_1 = arith.constant 0 : i32
    return %c0_i32, %c0_i32_0 : i32, i32
  }
  func.func @transform_3(%arg0: i32) -> (i32, i32) {
    %c0_i32 = arith.constant 0 : i32
    %c0_i32_0 = arith.constant 0 : i32
    %c0_i32_1 = arith.constant 0 : i32
    return %c0_i32, %c0_i32_0 : i32, i32
  }
  func.func @transform_4(%arg0: i32) -> (i32, i32) {
    %c0_i32 = arith.constant 0 : i32
    %c0_i32_0 = arith.constant 0 : i32
    %c0_i32_1 = arith.constant 0 : i32
    return %c0_i32, %c0_i32_0 : i32, i32
  }
  func.func @transform_5(%arg0: i32) -> (i32, i32) {
    %c0_i32 = arith.constant 0 : i32
    %c0_i32_0 = arith.constant 0 : i32
    %c0_i32_1 = arith.constant 0 : i32
    return %c0_i32, %c0_i32_0 : i32, i32
  }
  func.func @transform_6(%arg0: i32) -> (i32, i32) {
    %c0_i32 = arith.constant 0 : i32
    %c0_i32_0 = arith.constant 0 : i32
    %c0_i32_1 = arith.constant 0 : i32
    return %c0_i32, %c0_i32_0 : i32, i32
  }
  func.func @transform_7(%arg0: i32) -> (i32, i32) {
    %c0_i32 = arith.constant 0 : i32
    %c0_i32_0 = arith.constant 0 : i32
    %c0_i32_1 = arith.constant 0 : i32
    return %c0_i32, %c0_i32_0 : i32, i32
  }
  func.func @transform_8(%arg0: i32) -> (i32, i32) {
    %c0_i32 = arith.constant 0 : i32
    %c0_i32_0 = arith.constant 0 : i32
    %c0_i32_1 = arith.constant 0 : i32
    return %c0_i32, %c0_i32_0 : i32, i32
  }
  func.func @transform_9(%arg0: i32) -> (i32, i32) {
    %c0_i32 = arith.constant 0 : i32
    %c0_i32_0 = arith.constant 0 : i32
    %c0_i32_1 = arith.constant 0 : i32
    return %c0_i32, %c0_i32_0 : i32, i32
  }
  func.func @transform_10(%arg0: i32) -> (i32, i32) {
    %c0_i32 = arith.constant 0 : i32
    %c0_i32_0 = arith.constant 0 : i32
    %c0_i32_1 = arith.constant 0 : i32
    return %c0_i32, %c0_i32_0 : i32, i32
  }
  func.func @transform_11(%arg0: i32) -> (i32, i32) {
    %c0_i32 = arith.constant 0 : i32
    %c0_i32_0 = arith.constant 0 : i32
    %c0_i32_1 = arith.constant 0 : i32
    return %c0_i32, %c0_i32_0 : i32, i32
  }
}

</mosaic_0001>

<bundles_post_ra>
// kernel: hyper_classification_forward.6
= control target key start
LH: loop header
LB: loop body
LE: loop exit
PB: predicated region body
PF: predicated region fallthrough
CT: control target
= control target key end

     0   :  { %v203_v0 = vmov 0.0   ;;  %vm204_vm0 = vmmov 0   ;;  %vm66_vm1 = vcmask 523264   ;;  %s286_s2 = inlined_call_operand.vmem [shape: bf16[64,64], index: 2, kind: input, shape index: {}]   ;;  %s287_s0 = inlined_call_operand.vmem [shape: f32[16,64], index: 0, kind: input, shape index: {}]   ;;  %s288_s3 = inlined_call_operand.vmem [shape: f32[1,64], index: 3, kind: input, shape index: {}]   ;;  %s289_s1 = inlined_call_operand.vmem [shape: f32[16,64], index: 1, kind: input, shape index: {}]   ;;  %s290_s4 = inlined_call_operand.vmem [shape: f32[1,64], index: 4, kind: input, shape index: {}]   ;;  %s291_s5 = inlined_call_operand.vmem [shape: f32[1,64], index: 5, kind: input, shape index: {}]   ;;  %s292_s6 = inlined_call_operand.vmem [shape: f32[16,64], index: 6, kind: output, shape index: {}]  }
   0x1   :  { %181 = vmatprep.subr.bf16.mxu0 %v203_v0  ;;  %v195_v1 = vld [vmem:[%s286_s2 + $0x18] sm:$0xff]   ;;  %189 = vmatprep.mubr.msk.bf16.mxu0 %vm204_vm0, %v203_v0  ;;  %v196_v2 = vld [vmem:[%s286_s2 + $0x10] sm:$0xff]   ;;  %v197_v3 = vld [vmem:[%s286_s2 + $0x8] sm:$0xff]  }
   0x2   :  { %182 = vmatpush3.bf16.msra.mxu0 %v195_v1  ;;  %v198_v4 = vld [vmem:[%s286_s2] sm:$0xff]   ;;  %v25_v6 = vld [vmem:[%s287_s0 + $0x8] sm:$0xff] }
   0x3   :  { %183 = vmatprep.subr.bf16.mxu0 %v203_v0  ;;  %v24_v5 = vld [vmem:[%s287_s0] sm:$0xff]  ;;  %v112_v15 = vld [vmem:[%s289_s1 + $0x8] sm:$0xff] }
   0x4   :  { %v26_v7 = vpack.c.bf16 %v25_v6, %v24_v5  ;;  %v168_v8 = vld [vmem:[%s288_s3] ss:$0 sm:$0xff] }
   0x5   :  { %v111_v10 = vld [vmem:[%s289_s1] sm:$0xff] }
   0x6   :  { %184 = vmatpush3.bf16.msra.mxu0 %v196_v2  ;;  %v174_v40 = vld [vmem:[%s290_s4] ss:$0 sm:$0xff] }
   0x7   :  { %185 = vmatprep.subr.bf16.mxu0 %v203_v0  ;;  %v175_v42 = vld [vmem:[%s291_s5] ss:$0 sm:$0xff] }
   0xa   :  { %186 = vmatpush3.bf16.msra.mxu0 %v197_v3 }
   0xb   :  { %187 = vmatprep.subr.bf16.mxu0 %v203_v0 }
   0xe   :  { %188 = vmatpush3.bf16.msra.mxu0 %v198_v4 }
  0x11   :  { %190 = vmatmul.mubr.msk.bf16.vlgmr.msra.gmra.mxu0 %vm66_vm1, %v26_v7 }
  0xd1   :  { %v104_v9 = vpop.f32.mrf.mxu0 }
  0xd2   :  { %v105_v11 = vadd.f32 %v168_v8, %v104_v9 }
  0xd3   :  { %v191_v12 = vpop.f32.mrf.mxu0 }
  0xd4   :  { %v113_v13 = vadd.f32 %v111_v10, %v105_v11 }
  0xd5   :  { %v107_v14 = vpop.f32.mrf.mxu0 }
  0xd6   :  { %v108_v16 = vadd.f32 %v168_v8, %v107_v14  ;;  %v115_v17 = vmax.f32 %v113_v13, 0.0 }
  0xd7   :  { %v192_v18 = vpop.f32.mrf.mxu0 }
  0xd8   :  { %v114_v19 = vadd.f32 %v112_v15, %v108_v16  ;;  %v119_v20 = vsel %vm66_vm1, %v115_v17, 0.0 }
  0xd9   :  { %120 = vadd.xlane.f32.xlu0 %v119_v20 }
  0xda   :  { %v116_v21 = vmax.f32 %v114_v19, 0.0 }
  0xdc   :  { %v122_v22 = vsel %vm66_vm1, %v116_v21, 0.0 }
  0xdd   :  { %123 = vadd.xlane.f32.xlu0 %v122_v22 }
 0x162   :  { %v121_v23 = vpop.xlane.xlu0 %120 }
 0x163   :  { %v126_v24 = vmul.f32 0.015625, %v121_v23 }
 0x165   :  { %v128_v25 = vsub.f32 %v115_v17, %v126_v24 }
 0x166   :  { %v124_v26 = vpop.xlane.xlu0 %123 }
 0x167   :  { %v127_v27 = vmul.f32 0.015625, %v124_v26  ;;  %v130_v28 = vmul.f32 %v128_v25, %v128_v25 }
 0x169   :  { %v129_v29 = vsub.f32 %v116_v21, %v127_v27  ;;  %v132_v30 = vsel %vm66_vm1, %v130_v28, 0.0 }
 0x16a   :  { %133 = vadd.xlane.f32.xlu1 %v132_v30 }
 0x16b   :  { %v131_v31 = vmul.f32 %v129_v29, %v129_v29 }
 0x16d   :  { %v135_v32 = vsel %vm66_vm1, %v131_v31, 0.0 }
 0x16e   :  { %136 = vadd.xlane.f32.xlu1 %v135_v32 }
 0x1f3   :  { %v134_v33 = vpop.xlane.xlu1 %133 }
 0x1f4   :  { %v138_v34 = vmul.f32 0.015625, %v134_v33 }
 0x1f6   :  { %v140_v35 = vadd.f32 1e-05, %v138_v34 }
 0x1f7   :  { %v137_v36 = vpop.xlane.xlu1 %136 }
 0x1f8   :  { %199 = vrsqrt.f32 %v140_v35  ;;  %v139_v37 = vmul.f32 0.015625, %v137_v36 }
 0x1fa   :  { %v141_v38 = vadd.f32 1e-05, %v139_v37 }
 0x1fc   :  { %201 = vrsqrt.f32 %v141_v38 }
 0x205   :  { %v200_v39 = vpop.eup %199 }
 0x206   :  { %v144_v41 = vmul.f32 %v200_v39, %v128_v25 }
 0x208   :  { %v152_v43 = vmul.f32 %v174_v40, %v144_v41 }
 0x209   :  { %v202_v44 = vpop.eup %201 }
 0x20a   :  { %v160_v45 = vadd.f32 %v175_v42, %v152_v43  ;;  %v145_v46 = vmul.f32 %v202_v44, %v129_v29 }
 0x20c   :  { %162 = vst.msk [vmem:[%s292_s6] sm:$0xff] %vm66_vm1, %v160_v45  ;;  %v153_v47 = vmul.f32 %v174_v40, %v145_v46 }
 0x20e   :  { %v161_v48 = vadd.f32 %v175_v42, %v153_v47 }
 0x210   :  { %163 = vst.msk [vmem:[%s292_s6 + $0x8] sm:$0xff] %vm66_vm1, %v161_v48 }

// kernel: hyper_classification_forward.5
= control target key start
LH: loop header
LB: loop body
LE: loop exit
PB: predicated region body
PF: predicated region fallthrough
CT: control target
= control target key end

     0   :  { %v382_v0 = vmov 0   ;;  %v383_v2 = vmov 0.0   ;;  %vm384_vm0 = vmmov 0   ;;  %vm251_vm1 = vcmask 523264   ;;  %s515_s4 = inlined_call_operand.vmem [shape: bf16[192,64], index: 4, kind: input, shape index: {}]   ;;  %s516_s1 = inlined_call_operand.vmem [shape: bf16[128,64], index: 1, kind: input, shape index: {}]   ;;  %s517_s3 = inlined_call_operand.vmem [shape: f32[4,192], index: 3, kind: input, shape index: {}]   ;;  %s518_s0 = inlined_call_operand.vmem [shape: f32[6,128], index: 0, kind: input, shape index: {}]   ;;  %s519_s2 = inlined_call_operand.vmem [shape: f32[1,64], index: 2, kind: input, shape index: {}]   ;;  %s520_s6 = inlined_call_operand.vmem [shape: f32[6,64], index: 6, kind: output, shape index: {0}]   ;;  %s521_s5 = inlined_call_operand.vmem [shape: f32[1,64], index: 5, kind: input, shape index: {}]   ;;  %s522_s7 = inlined_call_operand.vmem [shape: f32[4,64], index: 7, kind: output, shape index: {1}]  }
   0x1   :  { %255 = vmatprep.subr.bf16.mxu1 %v382_v0  ;;  %v361_v1 = vld [vmem:[%s515_s4 + $0x38] sm:$0xff]   ;;  %338 = vmatprep.subr.bf16.mxu0 %v383_v2  ;;  %v362_v3 = vld [vmem:[%s515_s4 + $0x30] sm:$0xff]   ;;  %v363_v6 = vld [vmem:[%s515_s4 + $0x28] sm:$0xff]   ;;  %vm140_vm2 = vcmask 521216   ;;  %vm296_vm3 = vcmask 519168  }
   0x2   :  { %354 = vmatprep.mubr.msk.bf16.mxu0 %vm384_vm0, %v383_v2  ;;  %256 = vmatpush1.bf16.msra.mxu1 %v361_v1  ;;  %v364_v4 = vld [vmem:[%s516_s1 + $0x38] sm:$0xff]   ;;  %v366_v5 = vld [vmem:[%s516_s1 + $0x30] sm:$0xff]   ;;  %v368_v7 = vld [vmem:[%s516_s1 + $0x28] sm:$0xff]  }
   0x3   :  { %257 = vmatprep.subr.bf16.mxu1 %v382_v0  ;;  %339 = vmatpush3.bf16.msra.mxu0 %v364_v4  ;;  %v365_v8 = vld [vmem:[%s515_s4 + $0x20] sm:$0xff]   ;;  %v367_v10 = vld [vmem:[%s515_s4 + $0x18] sm:$0xff]   ;;  %v369_v12 = vld [vmem:[%s515_s4 + $0x10] sm:$0xff]  }
   0x4   :  { %340 = vmatprep.subr.bf16.mxu0 %v383_v2  ;;  %v370_v9 = vld [vmem:[%s516_s1 + $0x20] sm:$0xff]   ;;  %v372_v11 = vld [vmem:[%s516_s1 + $0x18] sm:$0xff]   ;;  %v374_v14 = vld [vmem:[%s516_s1 + $0x10] sm:$0xff]  }
   0x5   :  { %v142_v13 = vld [vmem:[%s517_s3] sm:$0xff]  ;;  %v371_v16 = vld [vmem:[%s515_s4 + $0x8] sm:$0xff]   ;;  %v375_v22 = vld [vmem:[%s515_s4 + $0x58] sm:$0xff]  }
   0x6   :  { %258 = vmatpush1.bf16.msra.mxu1 %v362_v3  ;;  %v169_v15 = vcombine.high %v142_v13, %v142_v13  ;;  %v376_v18 = vld [vmem:[%s516_s1 + $0x8] sm:$0xff]   ;;  %v373_v19 = vld [vmem:[%s515_s4] sm:$0xff]   ;;  %v377_v24 = vld [vmem:[%s515_s4 + $0x50] sm:$0xff]   ;;  %v171_v27 = vpack.c.bf16 %v142_v13, %v142_v13 }
   0x7   :  { %259 = vmatprep.subr.bf16.mxu1 %v382_v0  ;;  %341 = vmatpush3.bf16.msra.mxu0 %v366_v5  ;;  %v378_v20 = vld [vmem:[%s516_s1] sm:$0xff]   ;;  %v379_v25 = vld [vmem:[%s515_s4 + $0x48] sm:$0xff]  }
   0x8   :  { %342 = vmatprep.subr.bf16.mxu0 %v383_v2  ;;  %v172_v17 = vpack.c.bf16 %v169_v15, %v169_v15  ;;  %v26_v21 = vld [vmem:[%s518_s0] sm:$0x3f] }
   0x9   :  { %v44_v23 = vpack.c.bf16 %v26_v21, %v26_v21  ;;  %v380_v26 = vld [vmem:[%s515_s4 + $0x40] sm:$0xff]  }
   0xa   :  { %260 = vmatpush1.bf16.msra.mxu1 %v363_v6  ;;  %328 = vmatprep.mubr.msk.bf16.mxu1 %vm251_vm1, %v172_v17  ;;  %v306_v28 = vld [vmem:[%s519_s2] ss:$0 sm:$0xff] }
   0xb   :  { %261 = vmatprep.subr.bf16.mxu1 %v382_v0  ;;  %343 = vmatpush3.bf16.msra.mxu0 %v368_v7  ;;  %v315_v35 = vld [vmem:[%s521_s5] ss:$0 sm:$0xff] }
   0xc   :  { %344 = vmatprep.subr.bf16.mxu0 %v383_v2 }
   0xe   :  { %262 = vmatpush1.bf16.msra.mxu1 %v365_v8 }
   0xf   :  { %263 = vmatprep.subr.bf16.mxu1 %v382_v0  ;;  %345 = vmatpush3.bf16.msra.mxu0 %v370_v9 }
  0x10   :  { %346 = vmatprep.subr.bf16.mxu0 %v383_v2 }
  0x12   :  { %264 = vmatpush1.bf16.msra.mxu1 %v367_v10 }
  0x13   :  { %265 = vmatprep.subr.bf16.mxu1 %v382_v0  ;;  %347 = vmatpush3.bf16.msra.mxu0 %v372_v11 }
  0x14   :  { %348 = vmatprep.subr.bf16.mxu0 %v383_v2 }
  0x16   :  { %266 = vmatpush1.bf16.msra.mxu1 %v369_v12 }
  0x17   :  { %267 = vmatprep.subr.bf16.mxu1 %v382_v0  ;;  %349 = vmatpush3.bf16.msra.mxu0 %v374_v14 }
  0x18   :  { %350 = vmatprep.subr.bf16.mxu0 %v383_v2 }
  0x1a   :  { %268 = vmatpush1.bf16.msra.mxu1 %v371_v16 }
  0x1b   :  { %269 = vmatprep.subr.bf16.mxu1 %v382_v0  ;;  %351 = vmatpush3.bf16.msra.mxu0 %v376_v18 }
  0x1c   :  { %352 = vmatprep.subr.bf16.mxu0 %v383_v2 }
  0x1e   :  { %270 = vmatpush1.bf16.msra.mxu1 %v373_v19 }
  0x1f   :  { %279 = vmatprep.subr.bf16.mxu1 %v382_v0  ;;  %353 = vmatpush3.bf16.msra.mxu0 %v378_v20 }
  0x22   :  { %280 = vmatpush2.bf16.msra.mxu1 %v375_v22  ;;  %355 = vmatmul.mubr.bf16.vlgmr.msra.gmra.mxu0 %v44_v23 }
  0x23   :  { %281 = vmatprep.subr.bf16.mxu1 %v382_v0 }
  0x26   :  { %282 = vmatpush2.bf16.msra.mxu1 %v377_v24 }
  0x27   :  { %283 = vmatprep.subr.bf16.mxu1 %v382_v0 }
  0x2a   :  { %284 = vmatpush2.bf16.msra.mxu1 %v379_v25 }
  0x2b   :  { %285 = vmatprep.subr.bf16.mxu1 %v382_v0 }
  0x2e   :  { %286 = vmatpush2.bf16.msra.mxu1 %v380_v26 }
  0x31   :  { %288 = vmatmul.mubr.bf16.vlgmr.msra.gmra.mxu1 %v171_v27 }
  0xe2   :  { %v133_v29 = vpop.f32.mrf.mxu0 }
  0xe3   :  { %v134_v30 = vadd.f32 %v306_v28, %v133_v29 }
  0xe4   :  { %v356_v31 = vpop.f32.mrf.mxu0 }
  0xe5   :  { %v139_v32 = vmax.f32 %v134_v30, 0.0 }
  0xe6   :  { %v136_v33 = vpop.f32.mrf.mxu0 }
  0xe7   :  { %141 = vst.msk [vmem:[%s520_s6] sm:$0x3f] %vm140_vm2, %v139_v32 }
  0xe8   :  { %v357_v34 = vpop.f32.mrf.mxu0 }
  0xf1   :  { %v289_v36 = vpop.f32.mrf.mxu1 }
  0xf2   :  { %v290_v37 = vadd.f32 %v315_v35, %v289_v36 }
  0xf3   :  { %v291_v38 = vpop.f32.mrf.mxu1 }
  0xf4   :  { %v295_v39 = vmax.f32 %v290_v37, 0.0 }
  0xf5   :  { %v292_v40 = vpop.f32.mrf.mxu1 }
  0xf6   :  { %297 = vst.msk [vmem:[%s522_s7] sm:$0xf] %vm296_vm3, %v295_v39 }
  0xf7   :  { %v293_v41 = vpop.f32.mrf.mxu1 }

// kernel: hyper_classification_forward.9
= control target key start
LH: loop header
LB: loop body
LE: loop exit
PB: predicated region body
PF: predicated region fallthrough
CT: control target
= control target key end

     0   :  { %v362_v0 = vmov 0.0   ;;  %vm363_vm0 = vmmov 0   ;;  %vm82_vm1 = vcmask 523264   ;;  %vm128_vm2 = vcmask 518144   ;;  %s485_s1 = inlined_call_operand.vmem [shape: bf16[64,64], index: 1, kind: input, shape index: {}]   ;;  %s486_s0 = inlined_call_operand.vmem [shape: f32[3,64], index: 0, kind: input, shape index: {}]   ;;  %s487_s2 = inlined_call_operand.vmem [shape: f32[1,64], index: 2, kind: input, shape index: {}]   ;;  %s488_s5 = inlined_call_operand.vmem [shape: bf16[64,64], index: 5, kind: input, shape index: {}]   ;;  %s489_s3 = inlined_call_operand.vmem [shape: f32[1,64], index: 3, kind: input, shape index: {}]   ;;  %s490_s4 = inlined_call_operand.vmem [shape: f32[1,64], index: 4, kind: input, shape index: {}]   ;;  %s491_s6 = inlined_call_operand.vmem [shape: f32[1,64], index: 6, kind: input, shape index: {}]   ;;  %s492_s10 = inlined_call_operand.<no memory space> [shape: f32[1,1], index: 10, kind: input, shape index: {}]   ;;  %s493_s7 = inlined_call_operand.vmem [shape: f32[1,64], index: 7, kind: input, shape index: {}]   ;;  %s494_s8 = inlined_call_operand.vmem [shape: f32[1,64], index: 8, kind: input, shape index: {}]   ;;  %s495_s9 = inlined_call_operand.vmem [shape: f32[1,64], index: 9, kind: input, shape index: {}]   ;;  %s496_s11 = inlined_call_operand.vmem [shape: f32[3,1], index: 11, kind: output, shape index: {}]  }
   0x1   :  { %324 = vmatprep.subr.bf16.mxu0 %v362_v0  ;;  %v350_v1 = vld [vmem:[%s485_s1 + $0x18] sm:$0xff]   ;;  %332 = vmatprep.mubr.msk.bf16.mxu0 %vm363_vm0, %v362_v0  ;;  %v351_v2 = vld [vmem:[%s485_s1 + $0x10] sm:$0xff]   ;;  %v352_v3 = vld [vmem:[%s485_s1 + $0x8] sm:$0xff]   ;;  %v16_v46 = vstv %s492_s10  ;;  %vm290_vm3 = vcmask 2048  }
   0x2   :  { %336 = vmatprep.subr.bf16.mxu1 %v362_v0  ;;  %344 = vmatprep.mubr.msk.bf16.mxu1 %vm363_vm0, %v362_v0  ;;  %v353_v4 = vld [vmem:[%s485_s1] sm:$0xff]   ;;  %v354_v19 = vld [vmem:[%s488_s5 + $0x18] sm:$0xff]   ;;  %v355_v20 = vld [vmem:[%s488_s5 + $0x10] sm:$0xff]   ;;  %17 = vst [vmem:[#allocation2] sm:$0x1] %v16_v46 }
   0x3   :  { %325 = vmatpush3.bf16.msra.mxu0 %v350_v1  ;;  %v41_v5 = vld [vmem:[%s486_s0] sm:$0x7]  ;;  %337 = vmatpush3.bf16.msra.mxu1 %v354_v19  ;;  %v356_v21 = vld [vmem:[%s488_s5 + $0x8] sm:$0xff]  }
   0x4   :  { %326 = vmatprep.subr.bf16.mxu0 %v362_v0  ;;  %v42_v6 = vpack.c.bf16 %v41_v5, %v41_v5  ;;  %v296_v7 = vld [vmem:[%s487_s2] ss:$0 sm:$0xff]  ;;  %338 = vmatprep.subr.bf16.mxu1 %v362_v0 }
   0x5   :  { %v357_v22 = vld [vmem:[%s488_s5] sm:$0xff]  }
   0x6   :  { %v302_v27 = vld [vmem:[%s489_s3] ss:$0 sm:$0xff] }
   0x7   :  { %327 = vmatpush3.bf16.msra.mxu0 %v351_v2  ;;  %339 = vmatpush3.bf16.msra.mxu1 %v355_v20  ;;  %v303_v29 = vld [vmem:[%s490_s4] ss:$0 sm:$0xff] }
   0x8   :  { %328 = vmatprep.subr.bf16.mxu0 %v362_v0  ;;  %340 = vmatprep.subr.bf16.mxu1 %v362_v0  ;;  %v304_v34 = vld [vmem:[%s491_s6] ss:$0 sm:$0xff] }
   0x9   :  { %v310_v51 = vld [vmem:[%s493_s7] ss:$0 sm:$0xff] }
   0xa   :  { %v311_v53 = vld [vmem:[%s494_s8] ss:$0 sm:$0xff] }
   0xb   :  { %329 = vmatpush3.bf16.msra.mxu0 %v352_v3  ;;  %341 = vmatpush3.bf16.msra.mxu1 %v356_v21  ;;  %v312_v56 = vld [vmem:[%s495_s9] ss:$0 sm:$0xff] }
   0xc   :  { %330 = vmatprep.subr.bf16.mxu0 %v362_v0  ;;  %342 = vmatprep.subr.bf16.mxu1 %v362_v0  ;;  %v313_v60 = vld [vmem:[#allocation2] ss:$0 sm:$0xff] }
   0xf   :  { %331 = vmatpush3.bf16.msra.mxu0 %v353_v4  ;;  %343 = vmatpush3.bf16.msra.mxu1 %v357_v22 }
  0x12   :  { %333 = vmatmul.mubr.msk.bf16.vlgmr.msra.gmra.mxu0 %vm82_vm1, %v42_v6 }
  0xd2   :  { %v120_v8 = vpop.f32.mrf.mxu0 }
  0xd3   :  { %v121_v9 = vadd.f32 %v296_v7, %v120_v8 }
  0xd4   :  { %v334_v10 = vpop.f32.mrf.mxu0 }
  0xd5   :  { %v129_v11 = vsel %vm128_vm2, %v121_v9, 0.0 }
  0xd6   :  { %130 = vadd.xlane.f32.xlu0 %v129_v11  ;;  %v123_v12 = vpop.f32.mrf.mxu0 }
  0xd8   :  { %v335_v13 = vpop.f32.mrf.mxu0 }
 0x15f   :  { %v131_v14 = vpop.xlane.xlu0 %130 }
 0x160   :  { %v133_v15 = vmul.f32 0.015625, %v131_v14 }
 0x162   :  { %v134_v16 = vsub.f32 %v121_v9, %v133_v15 }
 0x164   :  { %v135_v17 = vmul.f32 %v134_v16, %v134_v16 }
 0x166   :  { %v136_v18 = vsel %vm128_vm2, %v135_v17, 0.0 }
 0x167   :  { %137 = vadd.xlane.f32.xlu0 %v136_v18 }
 0x1f0   :  { %v138_v23 = vpop.xlane.xlu0 %137 }
 0x1f1   :  { %v139_v24 = vmul.f32 0.015625, %v138_v23 }
 0x1f3   :  { %v140_v25 = vadd.f32 1e-05, %v139_v24 }
 0x1f5   :  { %358 = vrsqrt.f32 %v140_v25 }
 0x202   :  { %v359_v26 = vpop.eup %358 }
 0x203   :  { %v142_v28 = vmul.f32 %v359_v26, %v134_v16 }
 0x205   :  { %v149_v30 = vmul.f32 %v302_v27, %v142_v28 }
 0x207   :  { %v156_v31 = vadd.f32 %v303_v29, %v149_v30 }
 0x209   :  { %v157_v32 = vmax.f32 %v156_v31, 0.0 }
 0x20b   :  { %v158_v33 = vpack.c.bf16 %v157_v32, %v157_v32 }
 0x20d   :  { %345 = vmatmul.mubr.msk.bf16.vlgmr.msra.gmra.mxu1 %vm82_vm1, %v158_v33 }
 0x2cd   :  { %v235_v35 = vpop.f32.mrf.mxu1 }
 0x2ce   :  { %v236_v36 = vadd.f32 %v304_v34, %v235_v35 }
 0x2cf   :  { %v346_v37 = vpop.f32.mrf.mxu1 }
 0x2d0   :  { %v243_v38 = vsel %vm128_vm2, %v236_v36, 0.0 }
 0x2d1   :  { %244 = vadd.xlane.f32.xlu1 %v243_v38  ;;  %v238_v39 = vpop.f32.mrf.mxu1 }
 0x2d3   :  { %v347_v40 = vpop.f32.mrf.mxu1 }
 0x35a   :  { %v245_v41 = vpop.xlane.xlu1 %244 }
 0x35b   :  { %v246_v42 = vmul.f32 0.015625, %v245_v41 }
 0x35d   :  { %v247_v43 = vsub.f32 %v236_v36, %v246_v42 }
 0x35f   :  { %v248_v44 = vmul.f32 %v247_v43, %v247_v43 }
 0x361   :  { %v249_v45 = vsel %vm128_vm2, %v248_v44, 0.0 }
 0x362   :  { %250 = vadd.xlane.f32.xlu1 %v249_v45 }
 0x3eb   :  { %v251_v47 = vpop.xlane.xlu1 %250 }
 0x3ec   :  { %v252_v48 = vmul.f32 0.015625, %v251_v47 }
 0x3ee   :  { %v253_v49 = vadd.f32 1e-05, %v252_v48 }
 0x3f0   :  { %360 = vrsqrt.f32 %v253_v49 }
 0x3fd   :  { %v361_v50 = vpop.eup %360 }
 0x3fe   :  { %v255_v52 = vmul.f32 %v361_v50, %v247_v43 }
 0x400   :  { %v262_v54 = vmul.f32 %v310_v51, %v255_v52 }
 0x402   :  { %v269_v55 = vadd.f32 %v311_v53, %v262_v54 }
 0x404   :  { %v270_v57 = vmax.f32 %v269_v55, 0.0 }
 0x406   :  { %v279_v58 = vmul.f32 %v312_v56, %v270_v57 }
 0x408   :  { %v280_v59 = vsel %vm128_vm2, %v279_v58, 0.0 }
 0x409   :  { %281 = vadd.xlane.f32.xlu0 %v280_v59 }
 0x492   :  { %v282_v61 = vpop.xlane.xlu0 %281 }
 0x493   :  { %v289_v62 = vadd.f32 %v313_v60, %v282_v61 }
 0x495   :  { %291 = vst.msk [vmem:[%s496_s11] sm:$0x7] %vm290_vm3, %v289_v62 }

</bundles_post_ra>
